<compile_context>
chip_gen: v5e
topology: v5e:2x2
jax: 0.10.0
libtpu: 0.0.40
codegen_flags: <defaults>
</compile_context>

<pallas_src>
import jax
import jax.numpy as jnp
from jax import lax
from jax.experimental import pallas as pl
from jax.experimental.pallas import tpu as pltpu

LANE = 128


def _make_packed_kernel(inv_n: float, inv_nm1: float):
    """LayerNorm over H-lane segments of a 128-lane-packed row layout.

    Segmented row sums (and their broadcast back over each H-lane segment) are
    computed with one (tile, W) @ (W, W) block-diagonal-ones matmul on the MXU,
    keeping the VPU free for the elementwise epilogue.
    """

    def kernel(x_ref, bdiag_ref, gamma_ref, shift_ref, o_ref):
        x = x_ref[...].astype(jnp.float32)        # (tile, W)
        bd = bdiag_ref[...]                       # (W, W) block-diagonal ones
        gamma = gamma_ref[...]                    # (1, W)
        shift = shift_ref[...]                    # (1, W) = eps*gamma + beta

        # Per-segment sum, broadcast back over the segment in the same matmul.
        sum_b = jnp.dot(x, bd, preferred_element_type=jnp.float32)
        mean_b = sum_b * jnp.float32(inv_n)
        diff = x - mean_b
        sq_b = jnp.dot(diff * diff, bd, preferred_element_type=jnp.float32)
        inv_std = lax.rsqrt(sq_b * jnp.float32(inv_nm1))   # unbiased: / (N-1)
        o_ref[...] = (diff * inv_std * gamma + shift).astype(o_ref.dtype)

    return kernel


def _make_rowwise_kernel(inv_n: float, inv_nm1: float):
    """Fallback LayerNorm kernel (one logical row per vector row, XLU reductions)."""

    def kernel(x_ref, gamma_ref, shift_ref, o_ref):
        x = x_ref[...].astype(jnp.float32)        # (tile, H)
        gamma = gamma_ref[...]                    # (1, H)
        shift = shift_ref[...]                    # (1, H) = eps*gamma + beta

        mean = jnp.sum(x, axis=-1, keepdims=True) * jnp.float32(inv_n)
        diff = x - mean
        var = jnp.sum(diff * diff, axis=-1, keepdims=True) * jnp.float32(inv_nm1)
        inv_std = lax.rsqrt(var)
        o_ref[...] = (diff * inv_std * gamma + shift).astype(o_ref.dtype)

    return kernel


def layer_norm_pallas(x, gamma, beta, eps: float = 1e-5, target_tile: int = 2048):
    """x: (..., H). gamma/beta: (H,). Returns same shape/dtype as x.

    target_tile = (packed) rows per grid step; sweepable.  2048 * 128 lanes * 4 B
    ~= 1 MiB per block, so double-buffered in+out (~4 MiB) is comfortably inside the
    default scoped VMEM limit on every generation (including v7x's 64 MiB total).
    """
    orig_shape = x.shape
    orig_dtype = x.dtype
    H = orig_shape[-1]
    x2d = x.reshape(-1, H)
    R = x2d.shape[0]

    # Fold eps into the affine epilogue:
    #   ((x-mean)/std + eps) * gamma + beta == (x-mean)*inv_std*gamma + (eps*gamma + beta)
    gamma_f = gamma.astype(jnp.float32)
    shift_f = jnp.float32(eps) * gamma_f + beta.astype(jnp.float32)

    inv_n = 1.0 / H
    inv_nm1 = 1.0 / (H - 1) if H > 1 else float("nan")   # torch unbiased std of 1 elem -> nan

    # Lane packing: if H divides 128, pack `pack` logical rows per 128-lane row
    # so loads/stores are lane-dense (no masked vst at low lane occupancy).
    pack = LANE // H if (H < LANE and LANE % H == 0) else 1

    if pack > 1:
        W = pack * H
        r_pad = pl.cdiv(R, pack) * pack
        if r_pad != R:
            x2d = jnp.pad(x2d, ((0, r_pad - R), (0, 0)))
        Rp = r_pad // pack
        xw = x2d.reshape(Rp, W)
        gamma_w = jnp.tile(gamma_f, pack).reshape(1, W)
        shift_w = jnp.tile(shift_f, pack).reshape(1, W)
        seg = jnp.arange(W, dtype=jnp.int32) // H
        bdiag = (seg[:, None] == seg[None, :]).astype(jnp.float32)  # (W, W) block-diag ones
    else:
        W = H
        Rp = R
        xw = x2d
        gamma_w = gamma_f.reshape(1, W)
        shift_w = shift_f.reshape(1, W)
        bdiag = None

    # Row tiling: big blocks, safe remainder handling (never "whole huge array in one block").
    tile_target = max(8, (int(target_tile) // 8) * 8)
    if Rp <= tile_target:
        tile = Rp                       # single block == full array dims (allowed)
        r_grid = Rp
    else:
        tile = tile_target              # multiple of 8 sublanes
        r_grid = pl.cdiv(Rp, tile) * tile
        if r_grid != Rp:
            xw = jnp.pad(xw, ((0, r_grid - Rp), (0, 0)))
    grid = (r_grid // tile,)

    if pack > 1:
        kernel = _make_packed_kernel(inv_n, inv_nm1)
        in_specs = [
            pl.BlockSpec((tile, W), lambda i: (i, 0)),   # x (packed rows)
            pl.BlockSpec((W, W), lambda i: (0, 0)),      # block-diag ones (resident)
            pl.BlockSpec((1, W), lambda i: (0, 0)),      # gamma (broadcast, resident)
            pl.BlockSpec((1, W), lambda i: (0, 0)),      # eps*gamma + beta (resident)
        ]
        args = (xw, bdiag, gamma_w, shift_w)
    else:
        kernel = _make_rowwise_kernel(inv_n, inv_nm1)
        in_specs = [
            pl.BlockSpec((tile, W), lambda i: (i, 0)),
            pl.BlockSpec((1, W), lambda i: (0, 0)),
            pl.BlockSpec((1, W), lambda i: (0, 0)),
        ]
        args = (xw, gamma_w, shift_w)

    out = pl.pallas_call(
        kernel,
        out_shape=jax.ShapeDtypeStruct((r_grid, W), orig_dtype),
        grid_spec=pltpu.PrefetchScalarGridSpec(
            num_scalar_prefetch=0,
            grid=grid,
            in_specs=in_specs,
            out_specs=pl.BlockSpec((tile, W), lambda i: (i, 0)),
        ),
        compiler_params=pltpu.CompilerParams(
            dimension_semantics=("parallel",),   # row grid shards across TensorCores
        ),
    )(*args)

    # Undo grid padding / lane packing / row padding.
    if pack > 1:
        out = out[:Rp].reshape(-1, H)[:R]
    else:
        out = out[:R]
    return out.reshape(orig_shape)


def layer_norm_ref(x, gamma, beta, eps: float = 1e-5):
    """Pure-JAX reference matching the PyTorch module semantics exactly."""
    xf = x.astype(jnp.float32)
    mean = jnp.mean(xf, axis=-1, keepdims=True)
    n = x.shape[-1]
    var = jnp.sum((xf - mean) ** 2, axis=-1, keepdims=True) / (n - 1)  # unbiased, like torch.std
    std = jnp.sqrt(var)
    y = (xf - mean) / std + eps    # eps after the division, per the module (intentional)
    return (y * gamma + beta).astype(x.dtype)


if __name__ == "__main__":
    key = jax.random.PRNGKey(0)
    k1, k2, k3, k4 = jax.random.split(key, 4)

    # Case 1: module-sized demo (batch=2, seq=8, hidden=32) with default param init.
    B, S, H = 2, 8, 32
    x = jax.random.normal(k1, (B, S, H), dtype=jnp.float32)
    gamma = jnp.ones((H,), dtype=jnp.float32)
    beta = jnp.zeros((H,), dtype=jnp.float32)
    out = jax.block_until_ready(layer_norm_pallas(x, gamma, beta, eps=1e-5))
    ref = layer_norm_ref(x, gamma, beta, eps=1e-5)
    assert out.shape == x.shape and out.dtype == x.dtype
    assert jnp.allclose(out, ref, atol=1e-5, rtol=1e-5), "case 1 mismatch vs reference"

    # Case 2: non-trivial gamma/beta + ragged row count -> exercises pack padding,
    # the grid-remainder path and a multi-step parallel row grid.
    B2, S2, H2 = 2, 17, 32
    x2 = jax.random.normal(k2, (B2, S2, H2), dtype=jnp.float32)
    g2 = 1.0 + 0.1 * jax.random.normal(k3, (H2,), dtype=jnp.float32)
    b2 = 0.05 * jnp.arange(H2, dtype=jnp.float32)
    out2 = jax.block_until_ready(layer_norm_pallas(x2, g2, b2, eps=1e-5, target_tile=8))
    ref2 = layer_norm_ref(x2, g2, b2, eps=1e-5)
    assert jnp.allclose(out2, ref2, atol=1e-5, rtol=1e-5), "case 2 mismatch vs reference"

    # Case 3: H that cannot be lane-packed (128 % H != 0) -> row-wise fallback kernel.
    B3, S3, H3 = 2, 8, 96
    x3 = jax.random.normal(k4, (B3, S3, H3), dtype=jnp.float32)
    g3 = jnp.ones((H3,), dtype=jnp.float32)
    b3 = jnp.zeros((H3,), dtype=jnp.float32)
    out3 = jax.block_until_ready(layer_norm_pallas(x3, g3, b3, eps=1e-5))
    ref3 = layer_norm_ref(x3, g3, b3, eps=1e-5)
    assert jnp.allclose(out3, ref3, atol=1e-5, rtol=1e-5), "case 3 mismatch vs reference"

    print("KERNEL_OK")
</pallas_src>

<mosaic_0001>
module attributes {stable_mosaic.version = 11 : i64} {
  func.func @kernel(%arg0: i32, %arg1: memref<4x128xf32, #tpu.memory_space<vmem>>, %arg2: memref<128x128xf32, #tpu.memory_space<vmem>>, %arg3: memref<1x128xf32, #tpu.memory_space<vmem>>, %arg4: memref<1x128xf32, #tpu.memory_space<vmem>>, %arg5: memref<4x128xf32, #tpu.memory_space<vmem>>) attributes {dimension_semantics = [#tpu.dimension_semantics<parallel>], iteration_bounds = array<i64: 1>, scalar_prefetch = 0 : i64, scratch_operands = 0 : i64, tpu.core_type = #tpu.core_type<tc>, window_params = [{transform_indices = @transform_0, window_bounds = array<i64: 4, 128>}, {pipeline_mode = #tpu.pipeline_mode<synchronous>, transform_indices = @transform_1, window_bounds = array<i64: 128, 128>}, {pipeline_mode = #tpu.pipeline_mode<synchronous>, transform_indices = @transform_2, window_bounds = array<i64: 1, 128>}, {pipeline_mode = #tpu.pipeline_mode<synchronous>, transform_indices = @transform_3, window_bounds = array<i64: 1, 128>}, {transform_indices = @transform_4, window_bounds = array<i64: 4, 128>}]} {
    %c0 = arith.constant 0 : index
    %c0_0 = arith.constant 0 : index
    %0 = vector.load %arg1[%c0, %c0_0] : memref<4x128xf32, #tpu.memory_space<vmem>>, vector<4x128xf32>
    %c0_1 = arith.constant 0 : index
    %c0_2 = arith.constant 0 : index
    %1 = vector.load %arg2[%c0_1, %c0_2] : memref<128x128xf32, #tpu.memory_space<vmem>>, vector<128x128xf32>
    %c0_3 = arith.constant 0 : index
    %c0_4 = arith.constant 0 : index
    %2 = vector.load %arg3[%c0_3, %c0_4] : memref<1x128xf32, #tpu.memory_space<vmem>>, vector<1x128xf32>
    %c0_5 = arith.constant 0 : index
    %c0_6 = arith.constant 0 : index
    %3 = vector.load %arg4[%c0_5, %c0_6] : memref<1x128xf32, #tpu.memory_space<vmem>>, vector<1x128xf32>
    %cst = arith.constant dense<0.000000e+00> : vector<4x128xf32>
    %4 = tpu.matmul %0, %1, %cst {dimension_numbers = #tpu.dot_dimension_numbers<[1], [0], [0], [1], [0, 0, 1, 1], [], []>} : vector<4x128xf32>, vector<128x128xf32>, vector<4x128xf32> -> vector<4x128xf32>
    %cst_7 = arith.constant 3.125000e-02 : f32
    %5 = vector.broadcast %cst_7 : f32 to vector<4x128xf32>
    %6 = arith.mulf %4, %5 : vector<4x128xf32>
    %7 = arith.subf %0, %6 : vector<4x128xf32>
    %8 = arith.mulf %7, %7 : vector<4x128xf32>
    %cst_8 = arith.constant dense<0.000000e+00> : vector<4x128xf32>
    %9 = tpu.matmul %8, %1, %cst_8 {dimension_numbers = #tpu.dot_dimension_numbers<[1], [0], [0], [1], [0, 0, 1, 1], [], []>} : vector<4x128xf32>, vector<128x128xf32>, vector<4x128xf32> -> vector<4x128xf32>
    %cst_9 = arith.constant 0.0322580636 : f32
    %10 = vector.broadcast %cst_9 : f32 to vector<4x128xf32>
    %11 = arith.mulf %9, %10 : vector<4x128xf32>
    %12 = math.rsqrt %11 : vector<4x128xf32>
    %13 = arith.mulf %7, %12 : vector<4x128xf32>
    %14 = vector.broadcast %2 : vector<1x128xf32> to vector<4x128xf32>
    %15 = arith.mulf %13, %14 : vector<4x128xf32>
    %16 = vector.broadcast %3 : vector<1x128xf32> to vector<4x128xf32>
    %17 = arith.addf %15, %16 : vector<4x128xf32>
    %c0_10 = arith.constant 0 : index
    %c0_11 = arith.constant 0 : index
    %18 = vector.load %arg5[%c0_10, %c0_11] : memref<4x128xf32, #tpu.memory_space<vmem>>, vector<4x128xf32>
    tpu.vector_store %arg5[%c0_10, %c0_11], %17 {strides = array<i32>} : memref<4x128xf32, #tpu.memory_space<vmem>>, vector<4x128xf32>,
    return
  }
  func.func @transform_0(%arg0: i32) -> (i32, i32) {
    %c0_i32 = arith.constant 0 : i32
    %c0_i32_0 = arith.constant 0 : i32
    return %arg0, %c0_i32 : i32, i32
  }
  func.func @transform_1(%arg0: i32) -> (i32, i32) {
    %c0_i32 = arith.constant 0 : i32
    %c0_i32_0 = arith.constant 0 : i32
    %c0_i32_1 = arith.constant 0 : i32
    return %c0_i32, %c0_i32_0 : i32, i32
  }
  func.func @transform_2(%arg0: i32) -> (i32, i32) {
    %c0_i32 = arith.constant 0 : i32
    %c0_i32_0 = arith.constant 0 : i32
    %c0_i32_1 = arith.constant 0 : i32
    return %c0_i32, %c0_i32_0 : i32, i32
  }
  func.func @transform_3(%arg0: i32) -> (i32, i32) {
    %c0_i32 = arith.constant 0 : i32
    %c0_i32_0 = arith.constant 0 : i32
    %c0_i32_1 = arith.constant 0 : i32
    return %c0_i32, %c0_i32_0 : i32, i32
  }
  func.func @transform_4(%arg0: i32) -> (i32, i32) {
    %c0_i32 = arith.constant 0 : i32
    %c0_i32_0 = arith.constant 0 : i32
    return %arg0, %c0_i32 : i32, i32
  }
}

</mosaic_0001>

<bundles_post_ra>
// kernel: tpu_custom_call.1
= control target key start
LH: loop header
LB: loop body
LE: loop exit
PB: predicated region body
PF: predicated region fallthrough
CT: control target
= control target key end

     0   :  { %9 = vsyncpa [#allocation3], 0  ;;  %s281_s0 = inlined_call_operand.hbm [shape: f32[4,128], index: 0, kind: input, shape index: {}]   ;;  %s282_s1 = inlined_call_operand.hbm [shape: f32[128,128], index: 1, kind: input, shape index: {}]   ;;  %s283_s2 = inlined_call_operand.vmem [shape: f32[1,128], index: 2, kind: input, shape index: {}]   ;;  %s284_s3 = inlined_call_operand.vmem [shape: f32[1,128], index: 3, kind: input, shape index: {}]   ;;  %s285_s4 = inlined_call_operand.hbm [shape: f32[4,128], index: 4, kind: output, shape index: {}]  }
   0x1   :  { %10 = vsyncpa [#allocation6], 0 }
   0x2   :  { %11 = vsyncpa [#allocation4], 0  ;;  %s17_s17 = sshll.u32 %s281_s0, 4  ;;  %s236_s18 = smov [#allocation2]   ;;  %s18_s17 = int_to_ptr.hbm [resolvable:$true] %s17_s17 }
   0x3   :  { %s19_s19 = sshll.u32 %s236_s18, 4  ;;  %s27_s22 = sshll.u32 %s282_s1, 4  ;;  %s20_s19 = int_to_ptr.vmem [resolvable:$true] %s19_s19  ;;  %s28_s22 = int_to_ptr.hbm [resolvable:$true] %s27_s22 }
   0x4   :  { %22 = dma.hbm_to_vmem [thread:$0]  %s18_s17, 64, %s20_s19, [#allocation3]  }
   0x5   :  { %s237_s23 = smov [#allocation5]   ;;  %s238_s25 = smov 128  }
   0x6   :  { %s29_s24 = sshll.u32 %s237_s23, 4  ;;  %s239_s26 = smov 8   ;;  %s30_s24 = int_to_ptr.vmem [resolvable:$true] %s29_s24 }
   0x7   :  { %35 = dma.hbm_to_vmem [thread:$0]  %s28_s22, 2048, %s30_s24, [#allocation6], %s238_s25, %s238_s25, %s239_s26  }
   0x8   :  { %230 = dma.done.wait [#allocation3], 64  }
   0x9   :  { %231 = vsyncadd [#allocation3], 4294967232 }
   0xa   :  { %232 = dma.done.wait [#allocation6], 2048  }
   0xb   :  { %233 = vsyncadd [#allocation6], 4294965248  ;;  %v64_v0 = vld [vmem:[#allocation5 + $0x78] sm:$0xff]  ;;  %v63_v1 = vld [vmem:[#allocation5 + $0x70] sm:$0xff]  ;;  %s240_s29 = smov [#allocation7]   ;;  %s138_s7 = sshll.u32 %s285_s4, 4  ;;  %s139_s7 = int_to_ptr.hbm [resolvable:$true] %s138_s7 }
   0xc   :  { %67 = vmatpush.msra.mxu0 %v64_v0  ;;  %90 = vmatpush.msra.mxu1 %v64_v0  ;;  %v62_v2 = vld [vmem:[#allocation5 + $0x68] sm:$0xff]  ;;  %v61_v3 = vld [vmem:[#allocation5 + $0x60] sm:$0xff]  ;;  %v60_v4 = vld [vmem:[#allocation5 + $0x58] sm:$0xff]  ;;  %s136_s30 = sshll.u32 %s240_s29, 4  ;;  %s137_s30 = int_to_ptr.vmem [resolvable:$true] %s136_s30 }
   0xd   :  { %v59_v5 = vld [vmem:[#allocation5 + $0x50] sm:$0xff]  ;;  %v58_v6 = vld [vmem:[#allocation5 + $0x48] sm:$0xff]  ;;  %v57_v7 = vld [vmem:[#allocation5 + $0x40] sm:$0xff] }
   0xe   :  { %68 = vmatpush.msra.mxu0 %v63_v1  ;;  %91 = vmatpush.msra.mxu1 %v63_v1  ;;  %v56_v8 = vld [vmem:[#allocation5 + $0x38] sm:$0xff]  ;;  %v55_v9 = vld [vmem:[#allocation5 + $0x30] sm:$0xff]  ;;  %v54_v10 = vld [vmem:[#allocation5 + $0x28] sm:$0xff] }
   0xf   :  { %v53_v11 = vld [vmem:[#allocation5 + $0x20] sm:$0xff]  ;;  %v52_v12 = vld [vmem:[#allocation5 + $0x18] sm:$0xff]  ;;  %v51_v13 = vld [vmem:[#allocation5 + $0x10] sm:$0xff] }
  0x10   :  { %69 = vmatpush.msra.mxu0 %v62_v2  ;;  %92 = vmatpush.msra.mxu1 %v62_v2  ;;  %v50_v14 = vld [vmem:[#allocation5 + $0x8] sm:$0xff]  ;;  %v49_v15 = vld [vmem:[#allocation5] sm:$0xff]  ;;  %v48_v16 = vld [vmem:[#allocation2] sm:$0xf] }
  0x11   :  { %v154_v29 = vld [vmem:[%s283_s2] ss:$0 sm:$0xff] }
  0x12   :  { %70 = vmatpush.msra.mxu0 %v61_v3  ;;  %93 = vmatpush.msra.mxu1 %v61_v3  ;;  %v155_v32 = vld [vmem:[%s284_s3] ss:$0 sm:$0xff] }
  0x14   :  { %71 = vmatpush.msra.mxu0 %v60_v4  ;;  %94 = vmatpush.msra.mxu1 %v60_v4 }
  0x16   :  { %72 = vmatpush.msra.mxu0 %v59_v5  ;;  %95 = vmatpush.msra.mxu1 %v59_v5 }
  0x18   :  { %73 = vmatpush.msra.mxu0 %v58_v6  ;;  %96 = vmatpush.msra.mxu1 %v58_v6 }
  0x1a   :  { %74 = vmatpush.msra.mxu0 %v57_v7  ;;  %97 = vmatpush.msra.mxu1 %v57_v7 }
  0x1c   :  { %75 = vmatpush.msra.mxu0 %v56_v8  ;;  %98 = vmatpush.msra.mxu1 %v56_v8 }
  0x1e   :  { %76 = vmatpush.msra.mxu0 %v55_v9  ;;  %99 = vmatpush.msra.mxu1 %v55_v9 }
  0x20   :  { %77 = vmatpush.msra.mxu0 %v54_v10  ;;  %100 = vmatpush.msra.mxu1 %v54_v10 }
  0x22   :  { %78 = vmatpush.msra.mxu0 %v53_v11  ;;  %101 = vmatpush.msra.mxu1 %v53_v11 }
  0x24   :  { %79 = vmatpush.msra.mxu0 %v52_v12  ;;  %102 = vmatpush.msra.mxu1 %v52_v12 }
  0x26   :  { %80 = vmatpush.msra.mxu0 %v51_v13  ;;  %103 = vmatpush.msra.mxu1 %v51_v13 }
  0x28   :  { %81 = vmatpush.msra.mxu0 %v50_v14  ;;  %104 = vmatpush.msra.mxu1 %v50_v14 }
  0x2a   :  { %82 = vmatpush.msra.mxu0 %v49_v15  ;;  %105 = vmatpush.msra.mxu1 %v49_v15 }
  0x2b   :  { %83 = vmatmul.f32.vlgmr.msra.gmra.mxu0 %v48_v16 }
  0xa8   :  { %v84_v17 = vpop.f32.mrf.mxu0 }
  0xa9   :  { %v87_v18 = vmul.f32 0.03125, %v84_v17 }
  0xab   :  { %v88_v19 = vsub.f32 %v48_v16, %v87_v18 }
  0xad   :  { %v89_v20 = vmul.f32 %v88_v19, %v88_v19 }
  0xaf   :  { %106 = vmatmul.f32.vlgmr.msra.gmra.mxu1 %v89_v20 }
 0x12c   :  { %v107_v21 = vpop.f32.mrf.mxu1 }
 0x12d   :  { %v110_v22 = vmul.f32 0.032258064, %v107_v21 }
 0x12f   :  { %156 = vrsqrt.f32 %v110_v22  ;;  %vm117_vm1 = vweird.f32 %v110_v22 }
 0x135   :  { %v157_v23 = vpop.eup %156 }
 0x136   :  { %v112_v24 = vmul.f32 %v157_v23, %v110_v22  ;;  %vm118_vm0 = vweird.f32 %v157_v23 }
 0x137   :  { %vm119_vm2 = vmor %vm117_vm1, %vm118_vm0 }
 0x138   :  { %v113_v25 = vmul.f32 %v157_v23, %v112_v24 }
 0x13a   :  { %v114_v26 = vmul.f32 0.5, %v113_v25 }
 0x13c   :  { %v115_v27 = vsub.f32 1.5, %v114_v26 }
 0x13e   :  { %v116_v28 = vmul.f32 %v157_v23, %v115_v27 }
 0x140   :  { %v120_v30 = vsel %vm119_vm2, %v157_v23, %v116_v28 }
 0x141   :  { %v121_v31 = vmul.f32 %v120_v30, %v88_v19 }
 0x143   :  { %v125_v33 = vmul.f32 %v154_v29, %v121_v31 }
 0x145   :  { %v129_v34 = vadd.f32 %v155_v32, %v125_v33 }
 0x147   :  { %130 = vst [vmem:[#allocation7] sm:$0xf] %v129_v34 }
 0x148   :  { %141 = dma.vmem_to_hbm [thread:$0]  %s137_s30, 64, %s139_s7, [#allocation4]  }
 0x149   :  { %234 = dma.done.wait [#allocation4], 64  }
 0x14a   :  { %235 = vsyncadd [#allocation4], 4294967232 }
 0x14b   :  { %146 = vsyncpa [#allocation3], 1 }
 0x14c   :  { %147 = vsyncpa [#allocation6], 1 }
 0x14d   :  { %148 = vsyncpa [#allocation4], 1 }

</bundles_post_ra>
